<compile_context>
chip_gen: v7x
topology: tpu7x:2x2x1
jax: 0.10.0
libtpu: 0.0.40
codegen_flags: <defaults>
</compile_context>

<pallas_src>
import jax
import jax.numpy as jnp
from jax.experimental import pallas as pl
from jax.experimental.pallas import tpu as pltpu


def _efdmix_mix_kernel(perm_ref, lmda_ref, vx_ref, vp_ref, o_ref):
    """Elementwise mix in sorted order: o = lmda*vx + (1-lmda)*vp.

    perm_ref: (B,) int32 scalar-prefetch ref (only used by the index_maps).
    lmda_ref: (B,) f32 in SMEM.
    vx_ref  : (1, C, tile_n) sorted values of sample b                (VMEM).
    vp_ref  : (1, C, tile_n) sorted values of sample perm[b]          (VMEM).
    """
    del perm_ref  # consumed by the index_maps only
    lmda = lmda_ref[pl.program_id(0)]     # per-sample scalar from SMEM
    vx = vx_ref[...]
    vp = vp_ref[...]
    # lmda*vx + (1-lmda)*vp written as a single sub/mul/add chain on the VPU.
    o_ref[...] = vp + (vx - vp) * lmda


def _pick_tile_n(C, N, bytes_per_elem=4, vmem_budget_per_buf=2 << 20):
    """Lane-dense tile along the last (N = H*W) axis.

    Prefers multiples of 128 that divide N (unmasked vst), sized so a single
    (1, C, tile_n) buffer stays under a modest VMEM budget (3 operands, each
    double-buffered by the pipeline).  Falls back to the full row if N is not
    128-aligned.
    """
    if N % 128 != 0:
        return N
    max_tile = (vmem_budget_per_buf // (C * bytes_per_elem)) // 128 * 128
    t = min(N, max(128, max_tile), 4096)
    t = max(128, (t // 128) * 128)
    while N % t != 0:
        t -= 128
    return t


def efdmix_pallas(x, perm, lmda):
    """x: (B, C, H, W) f32, perm: (B,) int batch permutation, lmda: (B,) f32 Beta samples."""
    B, C, H, W = x.shape
    N = H * W
    xv = x.reshape(B, C, N).astype(jnp.float32)

    # TODO(synk): sort/argsort (rank computation) have no clean Pallas TPU
    # equivalent; kept as JAX glue around the kernel.
    iota = jax.lax.broadcasted_iota(jnp.int32, xv.shape, 2)
    value_x, index_x = jax.lax.sort((xv, iota), dimension=-1, num_keys=1, is_stable=True)
    ranks = jnp.argsort(index_x, axis=-1).astype(jnp.int32)    # inverse_index

    tile_n = _pick_tile_n(C, N)
    grid = (B, N // tile_n)

    perm_i32 = perm.astype(jnp.int32)
    lmda_f32 = lmda.astype(jnp.float32)

    # Memory-bound elementwise kernel: 2 reads + 1 write of (B, C, N) f32.
    # The permuted operand is read straight out of `value_x` via a
    # perm-indexed index_map (scalar prefetch), so value_x[perm] is never
    # materialized in HBM.
    mixed = pl.pallas_call(
        _efdmix_mix_kernel,
        out_shape=jax.ShapeDtypeStruct((B, C, N), jnp.float32),
        grid_spec=pltpu.PrefetchScalarGridSpec(
            num_scalar_prefetch=1,                              # perm -> SMEM
            grid=grid,
            in_specs=[
                pl.BlockSpec(memory_space=pltpu.MemorySpace.SMEM),           # lmda (B,) in SMEM
                pl.BlockSpec((1, C, tile_n), lambda b, n, perm: (b, 0, n)),  # value_x
                pl.BlockSpec((1, C, tile_n),
                             lambda b, n, perm: (perm[b], 0, n)),            # value_x[perm[b]]
            ],
            out_specs=pl.BlockSpec((1, C, tile_n), lambda b, n, perm: (b, 0, n)),
        ),
        compiler_params=pltpu.CompilerParams(
            dimension_semantics=("parallel", "parallel")),
        cost_estimate=pl.CostEstimate(
            flops=3 * B * C * N,
            transcendentals=0,
            bytes_accessed=3 * B * C * N * 4 + 2 * B * 4),
    )(perm_i32, lmda_f32, value_x, value_x)

    # TODO(synk): the single rank-gather (gather(-1, inverse_index)) has no
    # general cross-vreg Pallas TPU gather primitive; done once in JAX glue.
    out = jnp.take_along_axis(mixed, ranks, axis=-1)
    return out.reshape(B, C, H, W).astype(x.dtype)


if __name__ == "__main__":
    key = jax.random.PRNGKey(0)
    k_x, k_beta, k_perm = jax.random.split(key, 3)

    # Module hyperparameters (EFDMix.__init__): p=0.5, alpha=0.1, eps=1e-6, mix='random'.
    # eps is unused in the forward pass. The stochastic gate (training & random()<=p)
    # is assumed passed; mix='random' -> perm is a random batch permutation.
    B, C, H, W = 2, 4, 16, 16
    alpha = 0.1

    x = jax.random.normal(k_x, (B, C, H, W), dtype=jnp.float32)
    lmda = jax.random.beta(k_beta, alpha, alpha, shape=(B,)).astype(jnp.float32)
    perm = jax.random.permutation(k_perm, B)

    out = jax.block_until_ready(efdmix_pallas(x, perm, lmda))

    # Pure-JAX reference of the original forward math.
    N = H * W
    xv = x.reshape(B, C, N)
    value_x = jnp.sort(xv, axis=-1)
    inverse_index = jnp.argsort(jnp.argsort(xv, axis=-1), axis=-1)
    x_copy = jnp.take_along_axis(value_x[perm], inverse_index, axis=-1)
    ref = (xv + (x_copy - xv) * (1.0 - lmda[:, None, None])).reshape(B, C, H, W)

    assert out.shape == x.shape and out.dtype == jnp.float32
    assert jnp.allclose(out, ref, atol=1e-5, rtol=1e-5), "mismatch vs reference"
    print("KERNEL_OK")
</pallas_src>

<mosaic_0001>
module attributes {stable_mosaic.version = 11 : i64} {
  func.func @_efdmix_mix_kernel(%arg0: i32, %arg1: i32, %arg2: memref<2xi32, #tpu.memory_space<smem>>, %arg3: memref<2xf32, #tpu.memory_space<smem>>, %arg4: memref<1x4x256xf32, #tpu.memory_space<vmem>>, %arg5: memref<1x4x256xf32, #tpu.memory_space<vmem>>, %arg6: memref<1x4x256xf32, #tpu.memory_space<vmem>>) attributes {dimension_semantics = [#tpu.dimension_semantics<parallel>, #tpu.dimension_semantics<parallel>], iteration_bounds = array<i64: 2, 1>, scalar_prefetch = 1 : i64, scratch_operands = 0 : i64, tpu.core_type = #tpu.core_type<tc>, window_params = [{transform_indices = @transform_0, window_bounds = array<i64: 2>}, {transform_indices = @transform_1, window_bounds = array<i64: 1, 4, 256>}, {transform_indices = @transform_2, window_bounds = array<i64: 1, 4, 256>}, {transform_indices = @transform_3, window_bounds = array<i64: 1, 4, 256>}]} {
    %0 = arith.index_cast %arg0 : i32 to index
    %1 = memref.load %arg3[%0] : memref<2xf32, #tpu.memory_space<smem>>
    %c0 = arith.constant 0 : index
    %c0_0 = arith.constant 0 : index
    %c0_1 = arith.constant 0 : index
    %2 = vector.load %arg4[%c0, %c0_0, %c0_1] : memref<1x4x256xf32, #tpu.memory_space<vmem>>, vector<1x4x256xf32>
    %c0_2 = arith.constant 0 : index
    %c0_3 = arith.constant 0 : index
    %c0_4 = arith.constant 0 : index
    %3 = vector.load %arg5[%c0_2, %c0_3, %c0_4] : memref<1x4x256xf32, #tpu.memory_space<vmem>>, vector<1x4x256xf32>
    %4 = arith.subf %2, %3 : vector<1x4x256xf32>
    %5 = vector.broadcast %1 : f32 to vector<1x4x256xf32>
    %6 = arith.mulf %4, %5 : vector<1x4x256xf32>
    %7 = arith.addf %3, %6 : vector<1x4x256xf32>
    %c0_5 = arith.constant 0 : index
    %c0_6 = arith.constant 0 : index
    %c0_7 = arith.constant 0 : index
    %8 = vector.load %arg6[%c0_5, %c0_6, %c0_7] : memref<1x4x256xf32, #tpu.memory_space<vmem>>, vector<1x4x256xf32>
    tpu.vector_store %arg6[%c0_5, %c0_6, %c0_7], %7 {strides = array<i32>} : memref<1x4x256xf32, #tpu.memory_space<vmem>>, vector<1x4x256xf32>,
    return
  }
  func.func @transform_0(%arg0: i32, %arg1: i32, %arg2: memref<2xi32, #tpu.memory_space<smem>>) -> i32 {
    %c0_i32 = arith.constant 0 : i32
    %c0_i32_0 = arith.constant 0 : i32
    return %c0_i32 : i32
  }
  func.func @transform_1(%arg0: i32, %arg1: i32, %arg2: memref<2xi32, #tpu.memory_space<smem>>) -> (i32, i32, i32) {
    %c0_i32 = arith.constant 0 : i32
    %c0_i32_0 = arith.constant 0 : i32
    return %arg0, %c0_i32, %arg1 : i32, i32, i32
  }
  func.func @transform_2(%arg0: i32, %arg1: i32, %arg2: memref<2xi32, #tpu.memory_space<smem>>) -> (i32, i32, i32) {
    %0 = arith.index_cast %arg0 : i32 to index
    %1 = memref.load %arg2[%0] : memref<2xi32, #tpu.memory_space<smem>>
    %c0_i32 = arith.constant 0 : i32
    %c0_i32_0 = arith.constant 0 : i32
    return %1, %c0_i32, %arg1 : i32, i32, i32
  }
  func.func @transform_3(%arg0: i32, %arg1: i32, %arg2: memref<2xi32, #tpu.memory_space<smem>>) -> (i32, i32, i32) {
    %c0_i32 = arith.constant 0 : i32
    %c0_i32_0 = arith.constant 0 : i32
    return %arg0, %c0_i32, %arg1 : i32, i32, i32
  }
}

</mosaic_0001>

<bundles_post_ra>
// kernel: tpu_custom_call.1
= control target key start
LH: loop header
LB: loop body
LE: loop exit
PB: predicated region body
PF: predicated region fallthrough
CT: control target
= control target key end

     0   :  { %s1092_s0 = inlined_call_operand.hbm [shape: s32[2], index: 0, kind: input, shape index: {}]   ;;  %s1093_s1 = inlined_call_operand.vmem [shape: f32[2], index: 1, kind: input, shape index: {}]   ;;  %s1094_s2 = inlined_call_operand.hbm [shape: f32[2,4,256], index: 2, kind: input, shape index: {}]   ;;  %s1095_s3 = inlined_call_operand.hbm [shape: f32[2,4,256], index: 3, kind: input, shape index: {}]   ;;  %s1096_s4 = inlined_call_operand.hbm [shape: f32[2,4,256], index: 4, kind: output, shape index: {}]  }
   0x1   :  { %1106 = sst [smem:[#allocation22_spill]] %s1093_s1  ;;  %s551_s17 = scalar_lea.hbm %s1092_s0, 16 }
   0x2   :  { %p552_p0 = scmp.ne.s32.totalorder %s1092_s0, %s551_s17  ;;  %p555_p1 = scmp.lt.u32.totalorder %s551_s17, %s1092_s0 }
   0x4   :  { %p557_p2 = pnand %p555_p1, %p552_p0 }
   0x6   :  { %560 = shalt.err (!%p557_p2)  }
   0x7   :  { %s754_s22 = smov [#allocation3]  }
   0x8   :  { %10 = dma.hbm_to_smem %s1092_s0, 16, %s754_s22, [#allocation2] }
   0x9   :  { %700 = dma.done.wait [#allocation2], 16 }
   0xa   :  { %701 = vsyncadd [#allocation2], 4294967280 }
   0xb   :  { %12 = sfence }
   0xc   :  { %13 = vsyncpa [#allocation7], 0 }
   0xd   :  { %14 = vsyncpa [#allocation5], 0 }
   0xe   :  { %16 = vsyncpa [#allocation5 + $0x1], 0 }
   0xf   :  { %17 = vsyncpa [#allocation10], 0 }
  0x10   :  { %19 = vsyncpa [#allocation10 + $0x1], 0 }
  0x11   :  { %20 = vsyncpa [#allocation6], 0 }
  0x12   :  { %22 = vsyncpa [#allocation6 + $0x1], 0  ;;  %s796_s25 = smov 0   ;;  %s798_s26 = smov 0  }
  0x13   :  { %s800_s27 = smov 0   ;;  %s802_s28 = smov 0  }
  0x14   :  { %s804_s29 = smov 0   ;;  %s806_s0 = smov 0  }
  0x15   :  { %s808_s30 = smov 0   ;;  %s810_s5 = smov 0  }
  0x16   :  { %s812_s6 = smov 0  }
  0x17 LB: > { %1107 = sst [smem:[#allocation19_spill]] %s740_s0  ;;  %s420_s7 = sadd.s32 4294967295, %s752_s6   ;;  %s752_s6 = sphi %s812_s6, %s28_s6   ;;  %s748_s5 = sphi %s810_s5, %s1140_s5   ;;  %s744_s30 = sphi %s808_s30, %s1139_s30   ;;  %s740_s0 = sphi %s806_s0, %s1132_s0   ;;  %s736_s29 = sphi %s804_s29, %s1138_s29   ;;  %s732_s28 = sphi %s802_s28, %s1137_s28   ;;  %s728_s27 = sphi %s800_s27, %s1136_s27   ;;  %s724_s26 = sphi %s798_s26, %s1135_s26   ;;  %s720_s25 = sphi %s796_s25, %s1134_s25  }
  0x18   : > { %p113_p3 = scmp.ne.s32.totalorder %s724_s26, %s720_s25  ;;  %p841_p4 = scmp.eq.s32.totalorder %s420_s7, 0 }
  0x19   : > { %p845_p5 = scmp.eq.s32.totalorder %s420_s7, 1  ;;  %p422_p6 = scmp.ge.s32.totalorder %s752_s6, 1 }
  0x1a   : > { %s1108_s8 = scalar_select %p841_p4, 1, 0 }
  0x1b   : > { %p152_p7 = scmp.lt.s32.totalorder %s752_s6, 3  ;;  %p853_p8 = por %p113_p3, %p841_p4 }
  0x1c   : > { %s1112_s1 = sld [smem:[#allocation22_spill]] }
  0x1d   : > { %s1110_s10 = scalar_select %p853_p8, 1, 0 }
  0x1e   : > { %p857_p9 = pnand %p422_p6, %p152_p7 }
  0x20   : > { %p456_p10 = pneg %p857_p9 }
  0x22   : > { %s165_s14 = sshll.u32 %s1112_s1, 4  ;;  %p457_p12 = pnand %p456_p10, %p841_p4  ;;  %s166_s14 = int_to_ptr.vmem [resolvable:$true] %s165_s14 }
  0x23   : > { %s561_s15 = scalar_lea.vmem %s166_s14, 16  ;;  %p569_p3 = scmp.lt.s32.totalorder %s166_s14, %s166_s14 }
  0x24   : > { %p562_p13 = scmp.ne.s32.totalorder %s166_s14, %s561_s15  ;;  %p563_p0 = pneg %p457_p12 }
  0x25   : > { %p570_p6 = scmp.lt.s32.totalorder %s561_s15, %s561_s15 }
  0x26   : > { %p564_p1 = pnand %p563_p0, %p562_p13 }
  0x27   : > { %p571_p7 = por %p570_p6, %p569_p3 }
  0x28   : > { %p565_p2 = pneg %p564_p1 }
  0x2a   : > { %p572_p8 = pnand %p571_p7, %p565_p2 }
  0x2c   : > { %575 = shalt.err (!%p572_p8)
}
  0x2d   : > { %s755_s16 = smov [#allocation4]   ;;  %s421_s17 = sadd.s32 4294967294, %s752_s6  }
  0x2e   : > { %459 = dma.vmem_to_smem (!%p457_p12), %s166_s14, 16, %s755_s16, [#allocation7]  }
  0x2f   : > { %s40_s18 = sadd.s32 1, %s748_s5  ;;  %s70_s19 = sadd.s32 1, %s740_s0 }
  0x30   : > { %p42_p8 = scmp.ge.s32.totalorder %s40_s18, 2  ;;  %p77_p10 = scmp.ne.s32.totalorder %s740_s0, %s736_s29 }
  0x31   : > { %p1101_p13 = scmp.eq.s32.totalorder %s752_s6, 0  ;;  %p83_p12 = scmp.ne.s32.totalorder %s736_s29, %s732_s28 }
  0x32   : > { %s1142_s18 = smov (%p42_p8, %s40_s18), 0  ;;  %s888_s22 = sld [smem:[#allocation3 + %s748_s5]] }
  0x33   : > { %1113 = sst [smem:[#allocation20_spill]] %s1142_s18  ;;  %p879_p0 = por %p1101_p13, %p77_p10 }
  0x34   : > { %s65_s21 = ssub.s32 %s748_s5, %s1142_s18  ;;  %p892_p2 = por %p841_p4, %p83_p12 }
  0x35   : > { %p68_p1 = scmp.eq.s32.totalorder %s65_s21, 0  ;;  %s897_s24 = sld [smem:[#allocation3 + %s1142_s18]] }
  0x36   : > { %s1115_s23 = scalar_select %p892_p2, 1, 0 }
  0x37   : > { %p901_p3 = por %p845_p5, %p77_p10  ;;  %p145_p6 = scmp.eq.s32.totalorder %s421_s17, 1 }
  0x38   : > { %s906_s7 = scalar_select %p68_p1, %s740_s0, %s70_s19  }
  0x39   : > { %s1116_s25 = scalar_select %p901_p3, 1, 0 }
  0x3a   : > { %1117 = sst [smem:[#allocation21_spill]] %s906_s7  ;;  %p1100_p7 = scmp.lt.s32.totalorder %s752_s6, 2 }
  0x3b   : > { %s176_s12 = sand.u32 1, %s740_s0   ;;  %s441_s13 = sshll.u32 %s748_s5, 7 }
  0x3c   : > { %p911_p8 = por %p145_p6, %p83_p12  ;;  %s425_s15 = sshll.u32 %s176_s12, 3 }
  0x3d   : > { %s918_s1 = scalar_lea.hbm %s1094_s2, %s441_s13  ;;  %p924_p5 = pnand %p1100_p7, %p879_p0 }
  0x3e   : > { %s1118_s14 = scalar_select %p911_p8, 1, 0 }
  0x3f   : > { %s180_s17 = scalar_lea.vmem [#allocation8], %s425_s15  ;;  %s177_s18 = scalar_lea.sflag [#allocation5], %s176_s12 }
  0x40   : > { %s190_s19 = sshll.u32 %s180_s17, 4  ;;  %s576_s16 = scalar_lea.hbm %s918_s1, 128  ;;  %s928_s19 = int_to_ptr.vmem [resolvable:$true] %s190_s19 }
  0x41   : > { %p577_p10 = scmp.ne.s32.totalorder %s918_s1, %s576_s16  ;;  %p578_p12 = pneg %p924_p5 }
  0x42   : > { %s581_s21 = scalar_lea.hbm %s1094_s2, 256  ;;  %p582_p0 = scmp.lt.u32.totalorder %s918_s1, %s1094_s2 }
  0x43   : > { %p579_p1 = pnand %p578_p12, %p577_p10  ;;  %p583_p11 = scmp.lt.u32.totalorder %s581_s21, %s576_s16 }
  0x44   : > { %p585_p13 = scmp.lt.u32.totalorder %s576_s16, %s918_s1 }
  0x45   : > { %p580_p6 = pneg %p579_p1  ;;  %p584_p7 = por %p583_p11, %p582_p0 }
  0x47   : > { %p586_p8 = por %p585_p13, %p584_p7 }
  0x49   : > { %p587_p3 = pnand %p586_p8, %p580_p6 }
  0x4b   : > { %590 = shalt.err (!%p587_p3)
}
  0x4c   : > { %s591_s12 = scalar_lea.vmem %s928_s19, 128  ;;  %s756_s15 = smov [#allocation8]  }
  0x4d   : > { %p592_p10 = scmp.ne.s32.totalorder %s928_s19, %s591_s12  ;;  %s596_s17 = sshll.u32 %s756_s15, 4  ;;  %s597_s17 = int_to_ptr.vmem [resolvable:$false] %s596_s17 }
  0x4e   : > { %s598_s0 = scalar_lea.vmem %s597_s17, 256  ;;  %p599_p4 = scmp.lt.s32.totalorder %s928_s19, %s597_s17 }
  0x4f   : > { %p594_p1 = pnand %p592_p10, %p578_p12  ;;  %p600_p11 = scmp.lt.s32.totalorder %s598_s0, %s591_s12 }
  0x51   : > { %p595_p2 = pneg %p594_p1  ;;  %p601_p0 = por %p600_p11, %p599_p4 }
  0x53   : > { %p602_p13 = pnand %p601_p0, %p595_p2 }
  0x55   : > { %605 = shalt.err (!%p602_p13)
}
  0x56   : > { %463 = dma.hbm_to_vmem [thread:$0]  (!%p924_p5), %s918_s1, 128, %s928_s19, %s177_s18  }
  0x57   : > { %s95_s7 = ssub.s32 %s888_s22, %s897_s24  ;;  %s100_s16 = sadd.s32 1, %s728_s27 }
  0x58   : > { %p98_p4 = scmp.eq.s32.totalorder %s95_s7, 0  ;;  %p107_p2 = scmp.ne.s32.totalorder %s728_s27, %s724_s26 }
  0x59   : > { %s197_s9 = sand.u32 1, %s728_s27   ;;  %p1120_p3 = scmp.eq.s32.totalorder %s752_s6, 0 }
  0x5a   : > { %s962_s20 = scalar_select %p98_p4, %s728_s27, %s100_s16  }
  0x5b   : > { %p109_p7 = por %p107_p2, %p1120_p3  ;;  %s428_s13 = sshll.u32 %s197_s9, 3 }
  0x5c   : > { %p1121_p8 = scmp.lt.s32.totalorder %s752_s6, 2  ;;  %s201_s18 = scalar_lea.vmem [#allocation9], %s428_s13 }
  0x5d   : > { %s447_s12 = scalar_select %p109_p7, [#allocation3], [#allocation12] }
  0x5e   : > { %p968_p12 = pnand %p1121_p8, %p109_p7  ;;  %p1123_p5 = pmov %p1121_p8 }
  0x5f   : > { %s448_s15 = scalar_select %p109_p7, %s748_s5, 0 }
  0x60   : > { %s1144_s12 = smov (!%p1123_p5, %s447_s12), [#allocation13]  ;;  %p1124_p6 = pmov %p1123_p5 }
  0x61   : > { %s212_s22 = sshll.u32 %s201_s18, 4  ;;  %s198_s7 = scalar_lea.sflag [#allocation10], %s197_s9  ;;  %s977_s22 = int_to_ptr.vmem [resolvable:$true] %s212_s22 }
  0x62   : > { %s1146_s15 = smov (!%p1124_p6, %s448_s15), 0  ;;  %p608_p1 = pneg %p968_p12 }
  0x63   : > { %s202_s1 = sld [smem:[%s1144_s12 + %s1146_s15]]  ;;  %s611_s15 = scalar_lea.hbm %s1095_s3, 256 }
  0x69   : > { %s442_s24 = sshll.u32 %s202_s1, 7 }
  0x6a   : > { %s982_s0 = scalar_lea.hbm %s1095_s3, %s442_s24 }
  0x6b   : > { %s606_s16 = scalar_lea.hbm %s982_s0, 128  ;;  %p612_p13 = scmp.lt.u32.totalorder %s982_s0, %s1095_s3 }
  0x6c   : > { %p607_p10 = scmp.ne.s32.totalorder %s982_s0, %s606_s16  ;;  %p613_p4 = scmp.lt.u32.totalorder %s611_s15, %s606_s16 }
  0x6d   : > { %p615_p3 = scmp.lt.u32.totalorder %s606_s16, %s982_s0 }
  0x6e   : > { %p609_p11 = pnand %p608_p1, %p607_p10  ;;  %p614_p2 = por %p613_p4, %p612_p13 }
  0x70   : > { %p610_p0 = pneg %p609_p11  ;;  %p616_p7 = por %p615_p3, %p614_p2 }
  0x72   : > { %p617_p8 = pnand %p616_p7, %p610_p0 }
  0x74   : > { %620 = shalt.err (!%p617_p8)
}
  0x75   : > { %s621_s9 = scalar_lea.vmem %s977_s22, 128  ;;  %s757_s24 = smov [#allocation9]  }
  0x76   : > { %p622_p5 = scmp.ne.s32.totalorder %s977_s22, %s621_s9  ;;  %s626_s19 = sshll.u32 %s757_s24, 4  ;;  %s627_s19 = int_to_ptr.vmem [resolvable:$false] %s626_s19 }
  0x77   : > { %s628_s17 = scalar_lea.vmem %s627_s19, 256  ;;  %p629_p11 = scmp.lt.s32.totalorder %s977_s22, %s627_s19 }
  0x78   : > { %p624_p6 = pnand %p622_p5, %p608_p1  ;;  %p630_p13 = scmp.lt.s32.totalorder %s628_s17, %s621_s9 }
  0x7a   : > { %p625_p10 = pneg %p624_p6  ;;  %p631_p4 = por %p630_p13, %p629_p11 }
  0x7c   : > { %p632_p2 = pnand %p631_p4, %p625_p10 }
  0x7e   : > { %635 = shalt.err (!%p632_p2)
}
  0x7f   : > { %468 = dma.hbm_to_vmem [thread:$0]  (!%p968_p12), %s982_s0, 128, %s977_s22, %s198_s7  }
  0x80   : > { %221 = sbr.rel (%p857_p9) target bundleno = 172 (0xac), region = 32  ;;  %p1125_p1 = scmp.ne.s32.totalorder (!%p857_p9), %s1108_s8, 0 }
  0x87   : > { %703 = dma.done.wait (%p1125_p1), [#allocation7], 16  }
  0x88   : > { %705 = vsyncadd (%p1125_p1), [#allocation7], 4294967280  ;;  %s1016_s16 = sand.u32 1, %s736_s29   ;;  %p1126_p0 = scmp.ne.s32.totalorder %s1115_s23, 0 }
  0x89   : > { %s433_s13 = sshll.u32 %s1016_s16, 3  ;;  %s228_s21 = scalar_lea.sflag [#allocation5], %s1016_s16 }
  0x8a   : > { %s231_s12 = scalar_lea.vmem [#allocation8], %s433_s13 }
  0x8b   : > { %707 = dma.done.wait (%p1126_p0), %s228_s21, 128  }
  0x8c   : > { %709 = vsyncadd (%p1126_p0), %s228_s21, 4294967168  ;;  %s236_s11 = sand.u32 1, %s724_s26   ;;  %p1127_p9 = scmp.ne.s32.totalorder %s1110_s10, 0 }
  0x8d   : > { %s434_s22 = sshll.u32 %s236_s11, 3  ;;  %s237_s8 = scalar_lea.sflag [#allocation10], %s236_s11 }
  0x8e   : > { %s240_s0 = scalar_lea.vmem [#allocation9], %s434_s22 }
  0x8f   : > { %711 = dma.done.wait (%p1127_p9), %s237_s8, 128  }
  0x90   : > { %713 = vsyncadd (%p1127_p9), %s237_s8, 4294967168 }
  0x91   : > { %245 = sfence }
  0x92   : > { %s273_s7 = sld [smem:[#allocation4 + %s744_s30]]  ;;  %v274_v0 = vld [vmem:[%s231_s12] sm:$0xff]  ;;  %v275_v1 = vld [vmem:[%s240_s0] sm:$0xff]  ;;  %s268_s23 = scalar_lea.vmem [#allocation11], %s433_s13 }
  0x93   : > { %v276_v2 = vsub.f32 %v274_v0, %v275_v1  ;;  %s298_s15 = sshll.u32 %s268_s23, 4  ;;  %s443_s1 = sshll.u32 %s744_s30, 7  ;;  %s1031_s15 = int_to_ptr.vmem [resolvable:$true] %s298_s15 }
  0x94   : > { %s1036_s9 = scalar_lea.hbm %s1096_s4, %s443_s1  ;;  %s282_s24 = scalar_lea.sflag [#allocation6], %s1016_s16 }
  0x95   : > { %s636_s19 = scalar_lea.vmem %s1031_s15, 128  ;;  %p1128_p3 = scmp.ne.s32.totalorder %s1116_s25, 0 }
  0x96   : > { %p637_p12 = scmp.ne.s32.totalorder %s1031_s15, %s636_s19  ;;  %s758_s30 = smov [#allocation11]  }
  0x97   : > { %s640_s17 = sshll.u32 %s758_s30, 4  ;;  %s641_s17 = int_to_ptr.vmem [resolvable:$false] %s640_s17 }
  0x98   : > { %v277_v3 = vstv %s273_s7  ;;  %p638_p7 = pnand %p637_p12, %p1128_p3  ;;  %s642_s13 = scalar_lea.vmem %s641_s17, 256 }
  0x99   : > { %v278_v4 = vmul.f32 %v277_v3, %v276_v2  ;;  %p643_p5 = scmp.lt.s32.totalorder %s1031_s15, %s641_s17  ;;  %p644_p6 = scmp.lt.s32.totalorder %s642_s13, %s636_s19 }
  0x9a   : > { %p639_p8 = pneg %p638_p7 }
  0x9b   : > { %v279_v5 = vadd.f32 %v278_v4, %v275_v1  ;;  %p645_p10 = por %p644_p6, %p643_p5 }
  0x9d   : > { %280 = vst [vmem:[%s268_s23] sm:$0xff] %v279_v5  ;;  %p646_p11 = pnand %p645_p10, %p639_p8 }
  0x9f   : > { %649 = shalt.err (!%p646_p11)
}
  0xa0   : > { %s650_s16 = scalar_lea.hbm %s1036_s9, 128  ;;  %s654_s11 = scalar_lea.hbm %s1096_s4, 256 }
  0xa1   : > { %p651_p13 = scmp.ne.s32.totalorder %s1036_s9, %s650_s16  ;;  %p655_p1 = scmp.lt.u32.totalorder %s1036_s9, %s1096_s4 }
  0xa2   : > { %p656_p0 = scmp.lt.u32.totalorder %s654_s11, %s650_s16  ;;  %p658_p12 = scmp.lt.u32.totalorder %s650_s16, %s1036_s9 }
  0xa3   : > { %p652_p4 = pnand %p651_p13, %p1128_p3 }
  0xa4   : > { %p657_p9 = por %p656_p0, %p655_p1 }
  0xa5   : > { %p653_p2 = pneg %p652_p4 }
  0xa6   : > { %p659_p7 = por %p658_p12, %p657_p9 }
  0xa8   : > { %p660_p8 = pnand %p659_p7, %p653_p2 }
  0xaa   : > { %663 = shalt.err (!%p660_p8)
}
  0xab   : > { %454 = dma.vmem_to_hbm [thread:$0]  (%p1128_p3), %s1031_s15, 128, %s1036_s9, %s282_s24  }
  0xac PF: > { %s310_s0 = sand.u32 1, %s732_s28   ;;  %p1129_p5 = scmp.ne.s32.totalorder %s1118_s14, 0 }
  0xad   : > { %p1130_p6 = scmp.ge.s32.totalorder %s752_s6, 2  ;;  %s311_s7 = scalar_lea.sflag [#allocation6], %s310_s0 }
  0xaf   : > { %p470_p10 = pnand %p1130_p6, %p1129_p5 }
  0xb1   : > { %715 = dma.done.wait (!%p470_p10), %s311_s7, 128  }
  0xb2   : > { %717 = vsyncadd (!%p470_p10), %s311_s7, 4294967168  ;;  %s28_s6 = sadd.s32 1, %s752_s6   ;;  %s1131_s23 = sld [smem:[#allocation19_spill]] }
  0xb3   : > { %p25_p11 = scmp.ge.s32.totalorder %s28_s6, 4   ;;  %s1132_s0 = sld [smem:[#allocation21_spill]] }
  0xb4   : > { %s1133_s15 = sld [smem:[#allocation20_spill]]  ;;  %s1134_s25 = smov %s724_s26 }
  0xb5   : > { %s1135_s26 = smov %s728_s27  ;;  %s1136_s27 = smov %s962_s20 }
  0xb6   : > { %s1137_s28 = smov %s736_s29  ;;  %s1139_s30 = smov %s748_s5 }
  0xb7   :  { %27 = sbr.rel (!%p25_p11) target bundleno = 23 (0x17), region = 95 }
  0xb8   : > { %s1138_s29 = smov %s1131_s23 }
  0xba   : > { %s1140_s5 = smov %s1133_s15 }
  0xbe   :  { %316 = vsyncpa [#allocation5], 1 }
  0xbf   :  { %318 = vsyncpa [#allocation5 + $0x1], 1 }
  0xc0   :  { %319 = vsyncpa [#allocation10], 1 }
  0xc1   :  { %321 = vsyncpa [#allocation10 + $0x1], 1 }
  0xc2   :  { %322 = vsyncpa [#allocation6], 1 }
  0xc3   :  { %324 = vsyncpa [#allocation6 + $0x1], 1 }
  0xc4   :  { %325 = vsyncpa [#allocation7], 1 }
  0xc5   :  { %327 = vsyncpa [#allocation7 + $0x1], 1 }

</bundles_post_ra>
